<compile_context>
chip_gen: v5e
topology: v5e:2x2
jax: 0.10.0
libtpu: 0.0.40
codegen_flags: <defaults>
</compile_context>

<pallas_src>
from functools import partial

import jax
import jax.numpy as jnp
from jax.experimental import pallas as pl
from jax.experimental.pallas import tpu as pltpu

HIDDEN = 64      # self.hidden in the PyTorch module
B_TILE = 8       # sequences per grid step in the fused cdssm kernel


# ---------------------------------------------------------------------------
# Kernel 1: fused cdssm_repre = Conv2d(1, H, (3, T)) + ReLU + max-pool,
# batched over B_TILE sequences per grid step, one K=3T matmul per step.
# ---------------------------------------------------------------------------
def _cdssm_kernel(win_ref, w_ref, b_ref, out_ref, *, b_tile, valid_len):
    # win_ref: (b_tile*Lp, 3T) bf16  sliding windows, row = seq * Lp + position
    # w_ref:   (3T, H)         bf16  conv weight (tap-major flattening)
    # b_ref:   (1, H)          f32   conv bias
    # out_ref: (b_tile, H)     f32   max-pooled features
    rows, _ = win_ref.shape
    lp = rows // b_tile
    h = out_ref.shape[-1]
    conv = jnp.dot(win_ref[...], w_ref[...],
                   preferred_element_type=jnp.float32)        # (rows, H) f32
    act = jnp.maximum(conv + b_ref[...], 0.0)                 # bias + ReLU
    act = act.reshape(b_tile, lp, h)
    # Zero out padded positions (>= valid_len).  ReLU output is >= 0, so 0 is
    # neutral for the max-pool.
    pos = jax.lax.broadcasted_iota(jnp.int32, (lp, h), 0)
    act = jnp.where((pos < valid_len)[None], act, 0.0)
    out_ref[...] = jnp.max(act, axis=1)                       # (b_tile, H)


def cdssm_repre_fused(win_flat, w_conv, b_conv, *, n_seq, lp, valid_len,
                      b_tile=B_TILE):
    """win_flat: (n_seq*lp, 3T) bf16 -> (n_seq, H) f32.  n_seq % b_tile == 0."""
    k, h = w_conv.shape
    grid = (n_seq // b_tile,)
    return pl.pallas_call(
        partial(_cdssm_kernel, b_tile=b_tile, valid_len=valid_len),
        out_shape=jax.ShapeDtypeStruct((n_seq, h), jnp.float32),
        grid=grid,
        in_specs=[
            pl.BlockSpec((b_tile * lp, k), lambda n: (n, 0)),
            pl.BlockSpec((k, h), lambda n: (0, 0)),
            pl.BlockSpec((1, h), lambda n: (0, 0)),
        ],
        out_specs=pl.BlockSpec((b_tile, h), lambda n: (n, 0)),
        compiler_params=pltpu.CompilerParams(dimension_semantics=("parallel",)),
    )(win_flat, w_conv, b_conv)


# ---------------------------------------------------------------------------
# Kernel 2: fused head — trans_q, block-diag(trans_d|trans_b|trans_cq), q*d,
# match_dense as a VPU multiply + lane reduction.
# ---------------------------------------------------------------------------
def _head_kernel(q_ref, dbc_ref, wq_ref, bq_ref, wdbc_ref, bdbc_ref,
                 wm_ref, bm_ref, out_ref):
    q = jnp.dot(q_ref[...], wq_ref[...],
                preferred_element_type=jnp.float32) + bq_ref[...]      # (bs, 3H)
    d = jnp.dot(dbc_ref[...], wdbc_ref[...],
                preferred_element_type=jnp.float32) + bdbc_ref[...]    # (bs, 3H)
    qd = q * d
    out_ref[...] = (jnp.sum(qd * wm_ref[...], axis=-1, keepdims=True)
                    + bm_ref[...])                                     # (bs, 1)


# ---------------------------------------------------------------------------
# Forward pass (glue in plain JAX: embedding gather, window build, mean(dcq))
# ---------------------------------------------------------------------------
def nrmftb_forward(params, inputs_q, inputs_d, inputs_dcq, inputs_dbody,
                   masks_q, masks_d, masks_dcq, masks_dbody):
    # NOTE: the reference PyTorch forward never uses the masks; kept for parity.
    del masks_q, masks_d, masks_dcq, masks_dbody
    emb = params["word_emb"]                               # (vocab, T) bf16, row 0 == 0
    bs, lq = inputs_q.shape
    ld = inputs_d.shape[1]
    lb = inputs_dbody.shape[1]
    _, max_num, lc = inputs_dcq.shape
    if not (lq == ld == lb == lc):
        # TODO(synk): support per-field maxlen (separate launches or
        # length-aware pooling); the model uses a single fixed maxlen.
        raise NotImplementedError("all cdssm inputs must share the same maxlen")
    L = lq                                                 # requires L >= 3
    T = emb.shape[1]
    H = params["b_conv"].shape[-1]

    # One fused batch of every sequence that goes through cdssm_repre.
    tokens = jnp.concatenate(
        [inputs_q, inputs_d, inputs_dbody, inputs_dcq.reshape(bs * max_num, lc)],
        axis=0)                                            # (N, L)
    n = tokens.shape[0]
    embed = jnp.take(emb, tokens, axis=0)                  # (N, L, T) bf16

    # Width-3 sliding windows flattened to K = 3T; pad positions to Lp (mult.
    # of 8) and N to a multiple of B_TILE.  Padded rows are masked in-kernel.
    valid_len = L - 2
    win = jnp.concatenate(
        [embed[:, 0:L - 2], embed[:, 1:L - 1], embed[:, 2:L]], axis=-1)  # (N, L-2, 3T)
    lp = ((valid_len + 7) // 8) * 8
    n_pad = ((n + B_TILE - 1) // B_TILE) * B_TILE
    win = jnp.pad(win, ((0, n_pad - n), (0, lp - valid_len), (0, 0)))
    win_flat = win.reshape(n_pad * lp, 3 * T)

    feats = cdssm_repre_fused(win_flat, params["w_conv"], params["b_conv"],
                              n_seq=n_pad, lp=lp, valid_len=valid_len)[:n]  # (N, H)

    q_feat = feats[0:bs]
    d_feat = feats[bs:2 * bs]
    b_feat = feats[2 * bs:3 * bs]
    # torch.mean over the max_num candidate queries.  trans_cq is affine, so
    # mean(trans_cq(x_i)) == trans_cq(mean(x_i)); trans_cq is applied in-kernel.
    cq_feat = jnp.mean(
        feats[3 * bs:3 * bs + bs * max_num].reshape(bs, max_num, H), axis=1)
    dbc = jnp.concatenate([d_feat, b_feat, cq_feat], axis=-1)   # (bs, 3H)

    sim = pl.pallas_call(
        _head_kernel,
        out_shape=jax.ShapeDtypeStruct((bs, 1), jnp.float32),
    )(q_feat, dbc, params["wq"], params["bq"], params["w_dbc"], params["b_dbc"],
      params["wm"], params["bm"])
    return sim[:, 0]                                       # matches sim.squeeze() -> (bs,)


# ---------------------------------------------------------------------------
# Pure-JAX reference (mirrors the PyTorch forward op-by-op, same bf16 weights)
# ---------------------------------------------------------------------------
def nrmftb_reference(params, inputs_q, inputs_d, inputs_dcq, inputs_dbody):
    emb = params["word_emb"].astype(jnp.float32)
    T = emb.shape[1]
    w3 = params["w_conv"].astype(jnp.float32).reshape(3, T, -1)
    b_conv = params["b_conv"]

    def cdssm(tokens):
        e = jnp.take(emb, tokens, axis=0)                  # (n, L, T)
        L = e.shape[1]
        conv = (jnp.einsum("nlt,th->nlh", e[:, 0:L - 2], w3[0])
                + jnp.einsum("nlt,th->nlh", e[:, 1:L - 1], w3[1])
                + jnp.einsum("nlt,th->nlh", e[:, 2:L], w3[2]) + b_conv)
        return jnp.max(jax.nn.relu(conv), axis=1)          # (n, H)

    q_repre = cdssm(inputs_q) @ params["wq"] + params["bq"]
    d_repre = cdssm(inputs_d) @ params["wd"] + params["bd"]
    b_repre = cdssm(inputs_dbody) @ params["wb"] + params["bb"]
    bs, max_num, lc = inputs_dcq.shape
    dcq = cdssm(inputs_dcq.reshape(bs * max_num, lc)).reshape(bs, max_num, -1)
    cq_repre = jnp.mean(dcq @ params["wcq"] + params["bcq"], axis=1)
    d_cat = jnp.concatenate([d_repre, b_repre, cq_repre], axis=-1)
    sim = (q_repre * d_cat) @ params["wm"].T + params["bm"]
    return sim[:, 0]


# ---------------------------------------------------------------------------
# Deterministic parameter init (shapes from nrmftb.__init__)
# ---------------------------------------------------------------------------
def init_params(key, vocab_size, term_size, hidden=HIDDEN):
    ks = jax.random.split(key, 13)
    s = 0.1
    emb = s * jax.random.normal(ks[0], (vocab_size, term_size), jnp.float32)
    emb = emb.at[0].set(0.0)                               # padding_idx=0
    # Conv2d(1, H, (3, T)) weight as (3, T, H), stored flattened tap-major (3T, H)
    w_conv = s * jax.random.normal(ks[1], (3, term_size, hidden), jnp.float32)
    b_conv = s * jax.random.normal(ks[2], (1, hidden), jnp.float32)
    # Linear weights stored pre-transposed as (in, out); biases as (1, out)
    wq = s * jax.random.normal(ks[3], (hidden, 3 * hidden), jnp.float32)
    bq = s * jax.random.normal(ks[4], (1, 3 * hidden), jnp.float32)
    wd = s * jax.random.normal(ks[5], (hidden, hidden), jnp.float32)
    bd = s * jax.random.normal(ks[6], (1, hidden), jnp.float32)
    wb = s * jax.random.normal(ks[7], (hidden, hidden), jnp.float32)
    bb = s * jax.random.normal(ks[8], (1, hidden), jnp.float32)
    wcq = s * jax.random.normal(ks[9], (hidden, hidden), jnp.float32)
    bcq = s * jax.random.normal(ks[10], (1, hidden), jnp.float32)
    # match_dense: Linear(3H, 1) weight in PyTorch layout (1, 3H)
    wm = s * jax.random.normal(ks[11], (1, 3 * hidden), jnp.float32)
    bm = s * jax.random.normal(ks[12], (1, 1), jnp.float32)
    # trans_d / trans_b / trans_cq merged into one block-diagonal (3H, 3H)
    # weight so the head does a single lane-filling matmul.
    w_dbc = jnp.zeros((3 * hidden, 3 * hidden), jnp.float32)
    w_dbc = w_dbc.at[0:hidden, 0:hidden].set(wd)
    w_dbc = w_dbc.at[hidden:2 * hidden, hidden:2 * hidden].set(wb)
    w_dbc = w_dbc.at[2 * hidden:, 2 * hidden:].set(wcq)
    b_dbc = jnp.concatenate([bd, bb, bcq], axis=-1)
    return dict(
        word_emb=emb.astype(jnp.bfloat16),
        w_conv=w_conv.reshape(3 * term_size, hidden).astype(jnp.bfloat16),
        b_conv=b_conv,
        wq=wq, bq=bq, wd=wd, bd=bd, wb=wb, bb=bb, wcq=wcq, bcq=bcq,
        w_dbc=w_dbc, b_dbc=b_dbc, wm=wm, bm=bm,
    )


if __name__ == "__main__":
    key = jax.random.PRNGKey(0)
    vocab, term = 50, 32
    bs, L, max_num = 2, 8, 3

    pkey, ikey = jax.random.split(key)
    params = init_params(pkey, vocab, term)

    k1, k2, k3, k4 = jax.random.split(ikey, 4)
    inputs_q = jax.random.randint(k1, (bs, L), 0, vocab, jnp.int32)
    inputs_d = jax.random.randint(k2, (bs, L), 0, vocab, jnp.int32)
    inputs_dbody = jax.random.randint(k3, (bs, L), 0, vocab, jnp.int32)
    inputs_dcq = jax.random.randint(k4, (bs, max_num, L), 0, vocab, jnp.int32)
    # masks are accepted for signature parity but unused by the reference forward
    masks_q = jnp.ones((bs, L), jnp.float32)
    masks_d = jnp.ones((bs, L), jnp.float32)
    masks_dbody = jnp.ones((bs, L), jnp.float32)
    masks_dcq = jnp.ones((bs, max_num, L), jnp.float32)

    sim = jax.jit(nrmftb_forward)(params, inputs_q, inputs_d, inputs_dcq,
                                  inputs_dbody, masks_q, masks_d,
                                  masks_dcq, masks_dbody)
    sim = jax.block_until_ready(sim)
    assert sim.shape == (bs,), sim.shape

    # Correctness check against a pure-JAX reference using the same
    # bf16-quantized embedding/conv weights (loose tolerance covers MXU vs
    # XLA accumulation-order / precision differences).
    sim_ref = jax.jit(nrmftb_reference)(params, inputs_q, inputs_d, inputs_dcq,
                                        inputs_dbody)
    sim_ref = jax.block_until_ready(sim_ref)
    assert jnp.allclose(sim, sim_ref, atol=2e-2, rtol=5e-2), (sim, sim_ref)
    print("KERNEL_OK")
</pallas_src>

<mosaic_0001>
module attributes {stable_mosaic.version = 11 : i64} {
  func.func @_cdssm_kernel(%arg0: i32, %arg1: memref<64x96xbf16, #tpu.memory_space<vmem>>, %arg2: memref<96x64xbf16, #tpu.memory_space<vmem>>, %arg3: memref<1x64xf32, #tpu.memory_space<vmem>>, %arg4: memref<8x64xf32, #tpu.memory_space<vmem>>) attributes {dimension_semantics = [#tpu.dimension_semantics<parallel>], iteration_bounds = array<i64: 2>, scalar_prefetch = 0 : i64, scratch_operands = 0 : i64, tpu.core_type = #tpu.core_type<tc>, window_params = [{transform_indices = @transform_0, window_bounds = array<i64: 64, 96>}, {pipeline_mode = #tpu.pipeline_mode<synchronous>, transform_indices = @transform_1, window_bounds = array<i64: 96, 64>}, {pipeline_mode = #tpu.pipeline_mode<synchronous>, transform_indices = @transform_2, window_bounds = array<i64: 1, 64>}, {transform_indices = @transform_3, window_bounds = array<i64: 8, 64>}]} {
    %c0 = arith.constant 0 : index
    %c0_0 = arith.constant 0 : index
    %0 = vector.load %arg1[%c0, %c0_0] : memref<64x96xbf16, #tpu.memory_space<vmem>>, vector<64x96xbf16>
    %c0_1 = arith.constant 0 : index
    %c0_2 = arith.constant 0 : index
    %1 = vector.load %arg2[%c0_1, %c0_2] : memref<96x64xbf16, #tpu.memory_space<vmem>>, vector<96x64xbf16>
    %cst = arith.constant dense<0.000000e+00> : vector<64x64xf32>
    %2 = tpu.matmul %0, %1, %cst {dimension_numbers = #tpu.dot_dimension_numbers<[1], [0], [0], [1], [0, 0, 1, 1], [], []>} : vector<64x96xbf16>, vector<96x64xbf16>, vector<64x64xf32> -> vector<64x64xf32>
    %c0_3 = arith.constant 0 : index
    %c0_4 = arith.constant 0 : index
    %3 = vector.load %arg3[%c0_3, %c0_4] : memref<1x64xf32, #tpu.memory_space<vmem>>, vector<1x64xf32>
    %4 = vector.broadcast %3 : vector<1x64xf32> to vector<64x64xf32>
    %5 = arith.addf %2, %4 : vector<64x64xf32>
    %cst_5 = arith.constant 0.000000e+00 : f32
    %6 = vector.broadcast %cst_5 : f32 to vector<64x64xf32>
    %7 = arith.maximumf %5, %6 : vector<64x64xf32>
    %8 = vector.shape_cast %7 : vector<64x64xf32> to vector<8x8x64xf32>
    %9 = tpu.iota {dimensions = array<i32: 0>} : vector<8x64xi32>
    %c6_i32 = arith.constant 6 : i32
    %10 = vector.broadcast %c6_i32 : i32 to vector<8x64xi32>
    %11 = arith.cmpi slt, %9, %10 : vector<8x64xi32>
    %12 = vector.shape_cast %11 : vector<8x64xi1> to vector<1x8x64xi1>
    %cst_6 = arith.constant 0.000000e+00 : f32
    %13 = vector.shape_cast %12 : vector<1x8x64xi1> to vector<1x8x64xi1>
    %14 = vector.broadcast %13 : vector<1x8x64xi1> to vector<8x8x64xi1>
    %15 = vector.broadcast %cst_6 : f32 to vector<8x8x64xf32>
    %16 = arith.select %14, %8, %15 : vector<8x8x64xi1>, vector<8x8x64xf32>
    %cst_7 = arith.constant dense<0xFF800000> : vector<8x64xf32>
    %17 = vector.multi_reduction <maximumf>, %16, %cst_7 [1] : vector<8x8x64xf32> to vector<8x64xf32>
    %c0_8 = arith.constant 0 : index
    %c0_9 = arith.constant 0 : index
    %18 = vector.load %arg4[%c0_8, %c0_9] : memref<8x64xf32, #tpu.memory_space<vmem>>, vector<8x64xf32>
    tpu.vector_store %arg4[%c0_8, %c0_9], %17 {strides = array<i32>} : memref<8x64xf32, #tpu.memory_space<vmem>>, vector<8x64xf32>,
    return
  }
  func.func @transform_0(%arg0: i32) -> (i32, i32) {
    %c0_i32 = arith.constant 0 : i32
    %c0_i32_0 = arith.constant 0 : i32
    return %arg0, %c0_i32 : i32, i32
  }
  func.func @transform_1(%arg0: i32) -> (i32, i32) {
    %c0_i32 = arith.constant 0 : i32
    %c0_i32_0 = arith.constant 0 : i32
    %c0_i32_1 = arith.constant 0 : i32
    return %c0_i32, %c0_i32_0 : i32, i32
  }
  func.func @transform_2(%arg0: i32) -> (i32, i32) {
    %c0_i32 = arith.constant 0 : i32
    %c0_i32_0 = arith.constant 0 : i32
    %c0_i32_1 = arith.constant 0 : i32
    return %c0_i32, %c0_i32_0 : i32, i32
  }
  func.func @transform_3(%arg0: i32) -> (i32, i32) {
    %c0_i32 = arith.constant 0 : i32
    %c0_i32_0 = arith.constant 0 : i32
    return %arg0, %c0_i32 : i32, i32
  }
}

module attributes {stable_mosaic.version = 11 : i64} {
  func.func @_head_kernel(%arg0: memref<2x64xf32, #tpu.memory_space<vmem>>, %arg1: memref<2x192xf32, #tpu.memory_space<vmem>>, %arg2: memref<64x192xf32, #tpu.memory_space<vmem>>, %arg3: memref<1x192xf32, #tpu.memory_space<vmem>>, %arg4: memref<192x192xf32, #tpu.memory_space<vmem>>, %arg5: memref<1x192xf32, #tpu.memory_space<vmem>>, %arg6: memref<1x192xf32, #tpu.memory_space<vmem>>, %arg7: memref<1x1xf32, #tpu.memory_space<vmem>>, %arg8: memref<2x1xf32, #tpu.memory_space<vmem>>) attributes {dimension_semantics = [], scalar_prefetch = 0 : i64, scratch_operands = 0 : i64, tpu.core_type = #tpu.core_type<tc>} {
    %c0 = arith.constant 0 : index
    %c0_0 = arith.constant 0 : index
    %0 = vector.load %arg0[%c0, %c0_0] : memref<2x64xf32, #tpu.memory_space<vmem>>, vector<2x64xf32>
    %c0_1 = arith.constant 0 : index
    %c0_2 = arith.constant 0 : index
    %1 = vector.load %arg2[%c0_1, %c0_2] : memref<64x192xf32, #tpu.memory_space<vmem>>, vector<64x192xf32>
    %cst = arith.constant dense<0.000000e+00> : vector<2x192xf32>
    %2 = tpu.matmul %0, %1, %cst {dimension_numbers = #tpu.dot_dimension_numbers<[1], [0], [0], [1], [0, 0, 1, 1], [], []>} : vector<2x64xf32>, vector<64x192xf32>, vector<2x192xf32> -> vector<2x192xf32>
    %c0_3 = arith.constant 0 : index
    %c0_4 = arith.constant 0 : index
    %3 = vector.load %arg3[%c0_3, %c0_4] : memref<1x192xf32, #tpu.memory_space<vmem>>, vector<1x192xf32>
    %4 = vector.broadcast %3 : vector<1x192xf32> to vector<2x192xf32>
    %5 = arith.addf %2, %4 : vector<2x192xf32>
    %c0_5 = arith.constant 0 : index
    %c0_6 = arith.constant 0 : index
    %6 = vector.load %arg1[%c0_5, %c0_6] : memref<2x192xf32, #tpu.memory_space<vmem>>, vector<2x192xf32>
    %c0_7 = arith.constant 0 : index
    %c0_8 = arith.constant 0 : index
    %7 = vector.load %arg4[%c0_7, %c0_8] : memref<192x192xf32, #tpu.memory_space<vmem>>, vector<192x192xf32>
    %cst_9 = arith.constant dense<0.000000e+00> : vector<2x192xf32>
    %8 = tpu.matmul %6, %7, %cst_9 {dimension_numbers = #tpu.dot_dimension_numbers<[1], [0], [0], [1], [0, 0, 1, 1], [], []>} : vector<2x192xf32>, vector<192x192xf32>, vector<2x192xf32> -> vector<2x192xf32>
    %c0_10 = arith.constant 0 : index
    %c0_11 = arith.constant 0 : index
    %9 = vector.load %arg5[%c0_10, %c0_11] : memref<1x192xf32, #tpu.memory_space<vmem>>, vector<1x192xf32>
    %10 = vector.broadcast %9 : vector<1x192xf32> to vector<2x192xf32>
    %11 = arith.addf %8, %10 : vector<2x192xf32>
    %12 = arith.mulf %5, %11 : vector<2x192xf32>
    %c0_12 = arith.constant 0 : index
    %c0_13 = arith.constant 0 : index
    %13 = vector.load %arg6[%c0_12, %c0_13] : memref<1x192xf32, #tpu.memory_space<vmem>>, vector<1x192xf32>
    %14 = vector.broadcast %13 : vector<1x192xf32> to vector<2x192xf32>
    %15 = arith.mulf %12, %14 : vector<2x192xf32>
    %cst_14 = arith.constant dense<0.000000e+00> : vector<2xf32>
    %16 = vector.multi_reduction <add>, %15, %cst_14 [1] : vector<2x192xf32> to vector<2xf32>
    %17 = vector.shape_cast %16 : vector<2xf32> to vector<2x1xf32>
    %c0_15 = arith.constant 0 : index
    %c0_16 = arith.constant 0 : index
    %18 = vector.load %arg7[%c0_15, %c0_16] : memref<1x1xf32, #tpu.memory_space<vmem>>, vector<1x1xf32>
    %19 = vector.broadcast %18 : vector<1x1xf32> to vector<2x1xf32>
    %20 = arith.addf %17, %19 : vector<2x1xf32>
    %c0_17 = arith.constant 0 : index
    %c0_18 = arith.constant 0 : index
    %21 = vector.load %arg8[%c0_17, %c0_18] : memref<2x1xf32, #tpu.memory_space<vmem>>, vector<2x1xf32>
    tpu.vector_store %arg8[%c0_17, %c0_18], %20 {strides = array<i32>} : memref<2x1xf32, #tpu.memory_space<vmem>>, vector<2x1xf32>,
    return
  }
}

</mosaic_0001>

<bundles_post_ra>
// kernel: nrmftb_forward.2
= control target key start
LH: loop header
LB: loop body
LE: loop exit
PB: predicated region body
PF: predicated region fallthrough
CT: control target
= control target key end

     0   :  { %s568_s12 = smov 0   ;;  %s628_s0 = inlined_call_operand.vmem [shape: bf16[128,96], index: 0, kind: input, shape index: {}]   ;;  %s629_s1 = inlined_call_operand.vmem [shape: bf16[96,64], index: 1, kind: input, shape index: {}]   ;;  %s630_s2 = inlined_call_operand.vmem [shape: f32[1,64], index: 2, kind: input, shape index: {}]   ;;  %s631_s3 = inlined_call_operand.vmem [shape: f32[16,64], index: 3, kind: output, shape index: {}]  }
   0x1 LB: > { %s574_s13 = sadd.s32 4294967295, %s546_s12   ;;  %p453_p0 = scmp.ge.s32.totalorder %s546_s12, 1  ;;  %s546_s12 = sphi %s568_s12, %s13_s12  }
   0x2   : > { %p138_p1 = scmp.lt.s32.totalorder %s546_s12, 3 }
   0x4   : > { %p139_p2 = pnand %p453_p0, %p138_p1 }
   0x5   : > { %s454_s18 = sshll.u32 (!%p139_p2), %s574_s13, 3  ;;  %p167_p4 = scmp.lt.s32.totalorder (!%p139_p2), %s574_s13, 1 }
   0x6   : > { %142 = sbr.rel (%p139_p2) target bundleno = 198 (0xc6), region = 32  ;;  %p162_p3 = scmp.lt.s32.totalorder (!%p139_p2), %s454_s18, 15 }
   0xb   : > { %v512_v0 = vld [vmem:[%s629_s1 + $0x28] sm:$0xff]  ;;  %v511_v1 = vld [vmem:[%s629_s1 + $0x20] sm:$0xff]  ;;  %v510_v2 = vld [vmem:[%s629_s1 + $0x18] sm:$0xff]  ;;  %s633_s18 = smov (!%p162_p3, %s454_s18), 15  ;;  %vm252_vm0 = vcmask 785408   ;;  %v302_v10 = vlaneseq  ;;  %vm315_vm2 = vcmask 523264  }
   0xc   : > { %267 = vmatpush.bf16.msra.mxu0 %v512_v0  ;;  %513 = vmatpush.bf16.msra.mxu1 %v512_v0  ;;  %v509_v3 = vld [vmem:[%s629_s1 + $0x10] sm:$0xff]  ;;  %v508_v4 = vld [vmem:[%s629_s1 + $0x8] sm:$0xff]  ;;  %s455_s25 = sshll.u32 %s633_s18, 2  ;;  %v507_v5 = vld [vmem:[%s629_s1] sm:$0xff]  ;;  %vm380_vm3 = vcmask 1041409   ;;  %vm382_vm4 = vcmask 1042434  }
   0xd   : > { %514 = vmatpush.bf16.msra.mxu2 %v512_v0  ;;  %515 = vmatpush.bf16.msra.mxu3 %v512_v0  ;;  %s165_s30 = scalar_lea.vmem %s628_s0, %s455_s25  ;;  %v539_v11 = vld [vmem:[%s630_s2] ss:$0 sm:$0xff]  ;;  %v303_v12 = vshrl.u32 %v302_v10, 7  ;;  %vm384_vm5 = vcmask 1043459   ;;  %s635_s13 = smov (!%p167_p4, %s574_s13), 1  ;;  %vm386_vm6 = vcmask 1044484  }
   0xe   : > { %v503_v6 = vld [vmem:[%s165_s30] sm:$0xff]  ;;  %v504_v7 = vld [vmem:[%s165_s30 + $0x8] sm:$0xff]  ;;  %v505_v8 = vld [vmem:[%s165_s30 + $0x10] sm:$0xff]  ;;  %vm388_vm7 = vcmask 1045509   ;;  %s456_s6 = sshll.u32 %s635_s13, 3  ;;  %vm390_vm8 = vcmask 1046534  }
   0xf   : > { %v506_v9 = vld [vmem:[%s165_s30 + $0x18] sm:$0xff]  ;;  %vm304_vm1 = vcmp.lt.s32.totalorder %v303_v12, 6  ;;  %vm392_vm9 = vcmask 1047559   ;;  %s170_s9 = scalar_lea.vmem %s631_s3, %s456_s6 }
  0x10   : > { %268 = vmatpush.bf16.msra.mxu0 %v511_v1  ;;  %516 = vmatpush.bf16.msra.mxu1 %v511_v1 }
  0x11   : > { %517 = vmatpush.bf16.msra.mxu2 %v511_v1  ;;  %518 = vmatpush.bf16.msra.mxu3 %v511_v1 }
  0x14   : > { %269 = vmatpush.bf16.msra.mxu0 %v510_v2  ;;  %519 = vmatpush.bf16.msra.mxu1 %v510_v2 }
  0x15   : > { %520 = vmatpush.bf16.msra.mxu2 %v510_v2  ;;  %521 = vmatpush.bf16.msra.mxu3 %v510_v2 }
  0x18   : > { %270 = vmatpush.bf16.msra.mxu0 %v509_v3  ;;  %522 = vmatpush.bf16.msra.mxu1 %v509_v3 }
  0x19   : > { %523 = vmatpush.bf16.msra.mxu2 %v509_v3  ;;  %524 = vmatpush.bf16.msra.mxu3 %v509_v3 }
  0x1c   : > { %271 = vmatpush.bf16.msra.mxu0 %v508_v4  ;;  %525 = vmatpush.bf16.msra.mxu1 %v508_v4 }
  0x1d   : > { %526 = vmatpush.bf16.msra.mxu2 %v508_v4  ;;  %527 = vmatpush.bf16.msra.mxu3 %v508_v4 }
  0x20   : > { %272 = vmatpush.bf16.msra.mxu0 %v507_v5  ;;  %528 = vmatpush.bf16.msra.mxu1 %v507_v5 }
  0x21   : > { %529 = vmatpush.bf16.msra.mxu2 %v507_v5  ;;  %530 = vmatpush.bf16.msra.mxu3 %v507_v5 }
  0x23   : > { %497 = vmatmul.msk.bf16.vlgmr.msra.gmra.mxu0 %vm252_vm0, %v503_v6  ;;  %498 = vmatmul.msk.bf16.vlgmr.msra.gmra.mxu1 %vm252_vm0, %v504_v7 }
  0x24   : > { %499 = vmatmul.msk.bf16.vlgmr.msra.gmra.mxu2 %vm252_vm0, %v505_v8  ;;  %500 = vmatmul.msk.bf16.vlgmr.msra.gmra.mxu3 %vm252_vm0, %v506_v9 }
  0xa0   : > { %v274_v13 = vpop.f32.mrf.mxu0  ;;  %v279_v14 = vpop.f32.mrf.mxu1 }
  0xa1   : > { %v275_v15 = vadd.f32 %v539_v11, %v274_v13  ;;  %v280_v16 = vadd.f32 %v539_v11, %v279_v14 }
  0xa3   : > { %v294_v17 = vmax.f32 %v275_v15, 0.0  ;;  %v296_v18 = vmax.f32 %v280_v16, 0.0 }
  0xa5   : > { %v307_v19 = vsel %vm304_vm1, %v294_v17, 0.0  ;;  %v309_v20 = vsel %vm304_vm1, %v296_v18, 0.0 }
  0xa6   : > { %v316_v21 = vsel %vm315_vm2, %v307_v19, -inf  ;;  %v330_v22 = vsel %vm315_vm2, %v309_v20, -inf }
  0xa7   : > { %v317_v23 = vrot.slane %v316_v21, 4  ;;  %v284_v24 = vpop.f32.mrf.mxu2  ;;  %v289_v25 = vpop.f32.mrf.mxu3  ;;  %v331_v26 = vrot.slane %v330_v22, 4 }
  0xa8   : > { %v285_v27 = vadd.f32 %v539_v11, %v284_v24  ;;  %v290_v28 = vadd.f32 %v539_v11, %v289_v25  ;;  %v276_v29 = vpop.f32.mrf.mxu0  ;;  %v281_v30 = vpop.f32.mrf.mxu1 }
  0xa9   : > { %v277_v31 = vadd.f32 %v539_v11, %v276_v29  ;;  %v282_v32 = vadd.f32 %v539_v11, %v281_v30  ;;  %v318_v33 = vmax.f32 %v316_v21, %v317_v23  ;;  %v332_v38 = vmax.f32 %v330_v22, %v331_v26 }
  0xaa   : > { %v298_v34 = vmax.f32 %v285_v27, 0.0  ;;  %v300_v35 = vmax.f32 %v290_v28, 0.0 }
  0xab   : > { %v295_v36 = vmax.f32 %v277_v31, 0.0  ;;  %v297_v37 = vmax.f32 %v282_v32, 0.0  ;;  %v319_v43 = vrot.slane %v318_v33, 2  ;;  %v333_v51 = vrot.slane %v332_v38, 2 }
  0xac   : > { %v311_v39 = vsel %vm304_vm1, %v298_v34, 0.0  ;;  %v313_v40 = vsel %vm304_vm1, %v300_v35, 0.0 }
  0xad   : > { %v344_v41 = vsel %vm315_vm2, %v311_v39, -inf  ;;  %v358_v42 = vsel %vm315_vm2, %v313_v40, -inf  ;;  %v308_v45 = vsel %vm304_vm1, %v295_v36, 0.0  ;;  %v310_v46 = vsel %vm304_vm1, %v297_v37, 0.0 }
  0xae   : > { %v345_v44 = vrot.slane %v344_v41, 4  ;;  %v323_v47 = vsel %vm315_vm2, %v308_v45, -inf  ;;  %v337_v48 = vsel %vm315_vm2, %v310_v46, -inf  ;;  %v359_v52 = vrot.slane %v358_v42, 4 }
  0xaf   : > { %v286_v49 = vpop.f32.mrf.mxu2  ;;  %v291_v50 = vpop.f32.mrf.mxu3  ;;  %v324_v53 = vrot.slane %v323_v47, 4  ;;  %v338_v54 = vrot.slane %v337_v48, 4  ;;  %v320_v57 = vmax.f32 %v318_v33, %v319_v43  ;;  %v334_v63 = vmax.f32 %v332_v38, %v333_v51 }
  0xb0   : > { %v287_v55 = vadd.f32 %v539_v11, %v286_v49  ;;  %v292_v56 = vadd.f32 %v539_v11, %v291_v50  ;;  %v346_v58 = vmax.f32 %v344_v41, %v345_v44  ;;  %v360_v0 = vmax.f32 %v358_v42, %v359_v52 }
  0xb1   : > { %v325_v59 = vmax.f32 %v323_v47, %v324_v53  ;;  %v339_v60 = vmax.f32 %v337_v48, %v338_v54  ;;  %v321_v5 = vrot.slane %v320_v57, 1  ;;  %v335_v11 = vrot.slane %v334_v63, 1 }
  0xb2   : > { %v299_v61 = vmax.f32 %v287_v55, 0.0  ;;  %v301_v62 = vmax.f32 %v292_v56, 0.0  ;;  %v347_v6 = vrot.slane %v346_v58, 2  ;;  %v361_v13 = vrot.slane %v360_v0, 2 }
  0xb3   : > { %v326_v1 = vrot.slane %v325_v59, 2  ;;  %v340_v2 = vrot.slane %v339_v60, 2  ;;  %v322_v17 = vmax.f32 %v320_v57, %v321_v5  ;;  %v336_v22 = vmax.f32 %v334_v63, %v335_v11 }
  0xb4   : > { %v312_v3 = vsel %vm304_vm1, %v299_v61, 0.0  ;;  %v314_v4 = vsel %vm304_vm1, %v301_v62, 0.0  ;;  %v348_v18 = vmax.f32 %v346_v58, %v347_v6  ;;  %v362_v23 = vmax.f32 %v360_v0, %v361_v13 }
  0xb5   : > { %v327_v7 = vmax.f32 %v325_v59, %v326_v1  ;;  %v341_v8 = vmax.f32 %v339_v60, %v340_v2  ;;  %v351_v9 = vsel %vm315_vm2, %v312_v3, -inf  ;;  %v365_v10 = vsel %vm315_vm2, %v314_v4, -inf }
  0xb6   : > { %v352_v15 = vrot.slane %v351_v9, 4  ;;  %v366_v16 = vrot.slane %v365_v10, 4  ;;  %v349_v27 = vrot.slane %v348_v18, 1  ;;  %v363_v32 = vrot.slane %v362_v23, 1 }
  0xb7   : > { %v328_v14 = vrot.slane %v327_v7, 1  ;;  %v342_v19 = vrot.slane %v341_v8, 1 }
  0xb8   : > { %v353_v20 = vmax.f32 %v351_v9, %v352_v15  ;;  %v367_v21 = vmax.f32 %v365_v10, %v366_v16  ;;  %v350_v36 = vmax.f32 %v348_v18, %v349_v27  ;;  %v364_v38 = vmax.f32 %v362_v23, %v363_v32 }
  0xb9   : > { %v329_v12 = vmax.f32 %v327_v7, %v328_v14  ;;  %v343_v29 = vmax.f32 %v341_v8, %v342_v19 }
  0xba   : > { %v354_v25 = vrot.slane %v353_v20, 2  ;;  %v368_v26 = vrot.slane %v367_v21, 2 }
  0xbb   : > { %v381_v24 = vsel %vm380_vm3, %v329_v12, %v322_v17 }
  0xbc   : > { %v383_v28 = vsel %vm382_vm4, %v336_v22, %v381_v24  ;;  %v355_v30 = vmax.f32 %v353_v20, %v354_v25  ;;  %v369_v31 = vmax.f32 %v367_v21, %v368_v26 }
  0xbd   : > { %v385_v33 = vsel %vm384_vm5, %v343_v29, %v383_v28 }
  0xbe   : > { %v356_v34 = vrot.slane %v355_v30, 1  ;;  %v370_v35 = vrot.slane %v369_v31, 1  ;;  %v387_v39 = vsel %vm386_vm6, %v350_v36, %v385_v33 }
  0xc0   : > { %v357_v37 = vmax.f32 %v355_v30, %v356_v34  ;;  %v371_v41 = vmax.f32 %v369_v31, %v370_v35 }
  0xc2   : > { %v389_v40 = vsel %vm388_vm7, %v357_v37, %v387_v39 }
  0xc3   : > { %v391_v42 = vsel %vm390_vm8, %v364_v38, %v389_v40 }
  0xc4   : > { %v393_v43 = vsel %vm392_vm9, %v371_v41, %v391_v42 }
  0xc5   : > { %395 = vst.msk [vmem:[%s170_s9] sm:$0xff] %vm315_vm2, %v393_v43 }
  0xc6 PF: > { %s13_s12 = sadd.s32 1, %s546_s12  }
  0xc7   : > { %p10_p5 = scmp.ge.s32.totalorder %s13_s12, 4  }
  0xc9   :  { %12 = sbr.rel (!%p10_p5) target bundleno = 1 (0x1), region = 62 }

// kernel: nrmftb_forward.3
= control target key start
LH: loop header
LB: loop body
LE: loop exit
PB: predicated region body
PF: predicated region fallthrough
CT: control target
= control target key end

     0   :  { %vm54_vm0 = vcmask 523264   ;;  %vm250_vm1 = vcmask 1041408   ;;  %vm252_vm2 = vcmask 517120   ;;  %vm262_vm3 = vcmask 1024   ;;  %s535_s4 = inlined_call_operand.vmem [shape: f32[192,192], index: 4, kind: input, shape index: {}]   ;;  %s536_s2 = inlined_call_operand.vmem [shape: f32[64,192], index: 2, kind: input, shape index: {}]   ;;  %s537_s1 = inlined_call_operand.vmem [shape: f32[2,192], index: 1, kind: input, shape index: {}]   ;;  %s538_s0 = inlined_call_operand.vmem [shape: f32[2,64], index: 0, kind: input, shape index: {}]   ;;  %s539_s7 = inlined_call_operand.<no memory space> [shape: f32[1,1], index: 7, kind: input, shape index: {}]   ;;  %s540_s5 = inlined_call_operand.vmem [shape: f32[1,192], index: 5, kind: input, shape index: {}]   ;;  %s541_s3 = inlined_call_operand.vmem [shape: f32[1,192], index: 3, kind: input, shape index: {}]   ;;  %s542_s6 = inlined_call_operand.vmem [shape: f32[1,192], index: 6, kind: input, shape index: {}]   ;;  %s543_s8 = inlined_call_operand.vmem [shape: f32[2,1], index: 8, kind: output, shape index: {}]  }
   0x1   :  { %v129_v0 = vld [vmem:[%s535_s4 + $0xf0] sm:$0xff]  ;;  %v130_v1 = vld [vmem:[%s535_s4 + $0xf8] sm:$0xff]  ;;  %v127_v2 = vld [vmem:[%s535_s4 + $0xe0] sm:$0xff] }
   0x2   :  { %160 = vmatpush.msra.mxu2 %v129_v0  ;;  %200 = vmatpush.msra.mxu0 %v130_v1  ;;  %v128_v3 = vld [vmem:[%s535_s4 + $0xe8] sm:$0xff]  ;;  %v46_v4 = vld [vmem:[%s536_s2 + $0x70] sm:$0xff]  ;;  %v47_v5 = vld [vmem:[%s536_s2 + $0x78] sm:$0xff] }
   0x3   :  { %66 = vmatpush.msra.mxu3 %v46_v4  ;;  %86 = vmatpush.msra.mxu1 %v47_v5  ;;  %v125_v6 = vld [vmem:[%s535_s4 + $0xd0] sm:$0xff]  ;;  %v126_v7 = vld [vmem:[%s535_s4 + $0xd8] sm:$0xff]  ;;  %v44_v8 = vld [vmem:[%s536_s2 + $0x60] sm:$0xff]  ;;  %v13_v4 = vstv %s539_s7 }
   0x4   :  { %161 = vmatpush.msra.mxu2 %v127_v2  ;;  %201 = vmatpush.msra.mxu0 %v128_v3  ;;  %v45_v9 = vld [vmem:[%s536_s2 + $0x68] sm:$0xff]  ;;  %v123_v10 = vld [vmem:[%s535_s4 + $0xc0] sm:$0xff]  ;;  %v42_v12 = vld [vmem:[%s536_s2 + $0x50] sm:$0xff]  ;;  %14 = vst [vmem:[#allocation2] sm:$0x1] %v13_v4 }
   0x5   :  { %67 = vmatpush.msra.mxu3 %v44_v8  ;;  %87 = vmatpush.msra.mxu1 %v45_v9  ;;  %v124_v11 = vld [vmem:[%s535_s4 + $0xc8] sm:$0xff]  ;;  %v43_v13 = vld [vmem:[%s536_s2 + $0x58] sm:$0xff]  ;;  %v40_v14 = vld [vmem:[%s536_s2 + $0x40] sm:$0xff] }
   0x6   :  { %162 = vmatpush.msra.mxu2 %v125_v6  ;;  %202 = vmatpush.msra.mxu0 %v126_v7  ;;  %v41_v15 = vld [vmem:[%s536_s2 + $0x48] sm:$0xff]  ;;  %v121_v16 = vld [vmem:[%s535_s4 + $0xb0] sm:$0xff]  ;;  %v122_v17 = vld [vmem:[%s535_s4 + $0xb8] sm:$0xff] }
   0x7   :  { %68 = vmatpush.msra.mxu3 %v42_v12  ;;  %88 = vmatpush.msra.mxu1 %v43_v13  ;;  %v38_v18 = vld [vmem:[%s536_s2 + $0x30] sm:$0xff]  ;;  %v39_v19 = vld [vmem:[%s536_s2 + $0x38] sm:$0xff]  ;;  %v119_v20 = vld [vmem:[%s535_s4 + $0xa0] sm:$0xff] }
   0x8   :  { %163 = vmatpush.msra.mxu2 %v123_v10  ;;  %203 = vmatpush.msra.mxu0 %v124_v11  ;;  %v120_v21 = vld [vmem:[%s535_s4 + $0xa8] sm:$0xff]  ;;  %v36_v22 = vld [vmem:[%s536_s2 + $0x20] sm:$0xff]  ;;  %v117_v24 = vld [vmem:[%s535_s4 + $0x90] sm:$0xff] }
   0x9   :  { %69 = vmatpush.msra.mxu3 %v40_v14  ;;  %89 = vmatpush.msra.mxu1 %v41_v15  ;;  %v37_v23 = vld [vmem:[%s536_s2 + $0x28] sm:$0xff]  ;;  %v118_v25 = vld [vmem:[%s535_s4 + $0x98] sm:$0xff]  ;;  %v34_v26 = vld [vmem:[%s536_s2 + $0x10] sm:$0xff] }
   0xa   :  { %164 = vmatpush.msra.mxu2 %v121_v16  ;;  %204 = vmatpush.msra.mxu0 %v122_v17  ;;  %v35_v27 = vld [vmem:[%s536_s2 + $0x18] sm:$0xff]  ;;  %v115_v28 = vld [vmem:[%s535_s4 + $0x80] sm:$0xff]  ;;  %v116_v29 = vld [vmem:[%s535_s4 + $0x88] sm:$0xff] }
   0xb   :  { %70 = vmatpush.msra.mxu3 %v38_v18  ;;  %90 = vmatpush.msra.mxu1 %v39_v19  ;;  %v32_v30 = vld [vmem:[%s536_s2] sm:$0xff]  ;;  %v33_v31 = vld [vmem:[%s536_s2 + $0x8] sm:$0xff]  ;;  %v113_v32 = vld [vmem:[%s535_s4 + $0x70] sm:$0xff] }
   0xc   :  { %165 = vmatpush.msra.mxu2 %v119_v20  ;;  %205 = vmatpush.msra.mxu0 %v120_v21  ;;  %v114_v33 = vld [vmem:[%s535_s4 + $0x78] sm:$0xff]  ;;  %v145_v34 = vld [vmem:[%s535_s4 + $0x170] sm:$0xff]  ;;  %v111_v36 = vld [vmem:[%s535_s4 + $0x60] sm:$0xff] }
   0xd   :  { %71 = vmatpush.msra.mxu3 %v36_v22  ;;  %91 = vmatpush.msra.mxu1 %v37_v23  ;;  %v146_v35 = vld [vmem:[%s535_s4 + $0x178] sm:$0xff]  ;;  %v112_v37 = vld [vmem:[%s535_s4 + $0x68] sm:$0xff]  ;;  %v143_v38 = vld [vmem:[%s535_s4 + $0x160] sm:$0xff] }
   0xe   :  { %166 = vmatpush.msra.mxu2 %v117_v24  ;;  %206 = vmatpush.msra.mxu0 %v118_v25  ;;  %v144_v39 = vld [vmem:[%s535_s4 + $0x168] sm:$0xff]  ;;  %v109_v40 = vld [vmem:[%s535_s4 + $0x50] sm:$0xff]  ;;  %v110_v41 = vld [vmem:[%s535_s4 + $0x58] sm:$0xff] }
   0xf   :  { %72 = vmatpush.msra.mxu3 %v34_v26  ;;  %92 = vmatpush.msra.mxu1 %v35_v27  ;;  %v141_v42 = vld [vmem:[%s535_s4 + $0x150] sm:$0xff]  ;;  %v142_v43 = vld [vmem:[%s535_s4 + $0x158] sm:$0xff]  ;;  %v107_v44 = vld [vmem:[%s535_s4 + $0x40] sm:$0xff] }
  0x10   :  { %167 = vmatpush.msra.mxu2 %v115_v28  ;;  %207 = vmatpush.msra.mxu0 %v116_v29  ;;  %v108_v45 = vld [vmem:[%s535_s4 + $0x48] sm:$0xff]  ;;  %v139_v46 = vld [vmem:[%s535_s4 + $0x140] sm:$0xff]  ;;  %v105_v49 = vld [vmem:[%s535_s4 + $0x30] sm:$0xff] }
  0x11   :  { %73 = vmatpush.msra.mxu3 %v32_v30  ;;  %93 = vmatpush.msra.mxu1 %v33_v31  ;;  %v140_v47 = vld [vmem:[%s535_s4 + $0x148] sm:$0xff]  ;;  %v98_v48 = vld [vmem:[%s537_s1] sm:$0xf]  ;;  %v106_v50 = vld [vmem:[%s535_s4 + $0x38] sm:$0xff] }
  0x12   :  { %168 = vmatpush.msra.mxu2 %v113_v32  ;;  %208 = vmatpush.msra.mxu0 %v114_v33  ;;  %154 = vst [vmem:[#allocation1] ss:$4 sm:$0xff] %v98_v48  ;;  %v31_v51 = vld [vmem:[%s538_s0] sm:$0x3]  ;;  %v137_v53 = vld [vmem:[%s535_s4 + $0x130] sm:$0xff]  ;;  %v104_v54 = vld [vmem:[%s535_s4 + $0x28] sm:$0xff] }
  0x13   :  { %188 = vmatpush.msrb.mxu3 %v145_v34  ;;  %228 = vmatpush.msrb.mxu1 %v146_v35  ;;  %v103_v52 = vld [vmem:[%s535_s4 + $0x20] sm:$0xff]  ;;  %v138_v55 = vld [vmem:[%s535_s4 + $0x138] sm:$0xff]  ;;  %v101_v56 = vld [vmem:[%s535_s4 + $0x10] sm:$0xff] }
  0x14   :  { %169 = vmatpush.msra.mxu2 %v111_v36  ;;  %209 = vmatpush.msra.mxu0 %v112_v37  ;;  %v135_v57 = vld [vmem:[%s535_s4 + $0x120] sm:$0xff]  ;;  %v102_v58 = vld [vmem:[%s535_s4 + $0x18] sm:$0xff]  ;;  %v136_v59 = vld [vmem:[%s535_s4 + $0x128] sm:$0xff] }
  0x15   :  { %189 = vmatpush.msrb.mxu3 %v143_v38  ;;  %229 = vmatpush.msrb.mxu1 %v144_v39  ;;  %v99_v60 = vld [vmem:[%s535_s4] sm:$0xff]  ;;  %v133_v61 = vld [vmem:[%s535_s4 + $0x110] sm:$0xff]  ;;  %v100_v62 = vld [vmem:[%s535_s4 + $0x8] sm:$0xff] }
  0x16   :  { %170 = vmatpush.msra.mxu2 %v109_v40  ;;  %210 = vmatpush.msra.mxu0 %v110_v41  ;;  %v134_v63 = vld [vmem:[%s535_s4 + $0x118] sm:$0xff]  ;;  %v131_v1 = vld [vmem:[%s535_s4 + $0x100] sm:$0xff]  ;;  %v132_v2 = vld [vmem:[%s535_s4 + $0x108] sm:$0xff] }
  0x17   :  { %190 = vmatpush.msrb.mxu3 %v141_v42  ;;  %230 = vmatpush.msrb.mxu1 %v142_v43  ;;  %v147_v6 = vld [vmem:[%s540_s5] sm:$0x3]  ;;  %v272_v33 = vld [vmem:[#allocation2] ss:$0 sm:$0xff] }
  0x18   :  { %171 = vmatpush.msra.mxu2 %v107_v44  ;;  %211 = vmatpush.msra.mxu0 %v108_v45  ;;  %v150_v7 = vperm.slane %v147_v6, 1  ;;  %v48_v8 = vld [vmem:[%s541_s3] sm:$0x3]  ;;  %v149_v15 = vperm.slane %v147_v6, 0 }
  0x19   :  { %191 = vmatpush.msrb.mxu3 %v139_v46  ;;  %231 = vmatpush.msrb.mxu1 %v140_v47  ;;  %v155_v0 = vld.sshfl [vmem:[#allocation1] sm:$0xff pattern:$0x73625140]  ;;  %v156_v3 = vld.sshfl [vmem:[#allocation1 + $0x8] sm:$0xff pattern:$0x73625140] }
  0x1a   :  { %172 = vmatpush.msra.mxu2 %v105_v49  ;;  %212 = vmatpush.msra.mxu0 %v106_v50  ;;  %v51_v11 = vperm.slane %v48_v8, 1  ;;  %v242_v16 = vld [vmem:[%s542_s6] sm:$0x3]  ;;  %v50_v18 = vperm.slane %v48_v8, 0 }
  0x1b   :  { %268 = vmatmul.msk.f32.vlgmr.msra.gmra.mxu3 %vm54_vm0, %v31_v51  ;;  %269 = vmatmul.msk.f32.vlgmr.msra.gmra.mxu1 %vm54_vm0, %v31_v51  ;;  %v245_v22 = vperm.slane %v242_v16, 1  ;;  %v244_v26 = vperm.slane %v242_v16, 0 }
  0x1c   :  { %173 = vmatpush.msra.mxu2 %v103_v52  ;;  %192 = vmatpush.msrb.mxu3 %v137_v53 }
  0x1d   :  { %213 = vmatpush.msra.mxu0 %v104_v54  ;;  %232 = vmatpush.msrb.mxu1 %v138_v55 }
  0x1e   :  { %174 = vmatpush.msra.mxu2 %v101_v56  ;;  %193 = vmatpush.msrb.mxu3 %v135_v57 }
  0x1f   :  { %214 = vmatpush.msra.mxu0 %v102_v58  ;;  %233 = vmatpush.msrb.mxu1 %v136_v59 }
  0x20   :  { %175 = vmatpush.msra.mxu2 %v99_v60  ;;  %194 = vmatpush.msrb.mxu3 %v133_v61 }
  0x21   :  { %215 = vmatpush.msra.mxu0 %v100_v62  ;;  %234 = vmatpush.msrb.mxu1 %v134_v63 }
  0x22   :  { %176 = vmatmul.f32.vlgmr.msra.gmra.mxu2 %v155_v0  ;;  %216 = vmatmul.f32.vlgmr.msra.gmra.mxu0 %v155_v0 }
  0x23   :  { %195 = vmatpush.msrb.mxu3 %v131_v1  ;;  %235 = vmatpush.msrb.mxu1 %v132_v2 }
  0x24   :  { %270 = vmatmul.msk.f32.vlgmr.msrb.gmra.mxu3 %vm54_vm0, %v156_v3  ;;  %271 = vmatmul.msk.f32.vlgmr.msrb.gmra.mxu1 %vm54_vm0, %v156_v3 }
  0x98   :  { %v95_v5 = vpop.f32.mrf.mxu1 }
  0x99   :  { %v96_v17 = vadd.f32 %v95_v5, %v51_v11 }
  0x9e   :  { %v75_v9 = vpop.f32.mrf.mxu3 }
  0x9f   :  { %v217_v10 = vpop.f32.mrf.mxu0  ;;  %v76_v24 = vadd.f32 %v75_v9, %v50_v18 }
  0xa0   :  { %v218_v12 = vadd.f32 %v217_v10, %v150_v7 }
  0xa1   :  { %v237_v13 = vpop.f32.mrf.mxu1 }
  0xa2   :  { %v238_v14 = vadd.f32 %v237_v13, %v218_v12 }
  0xa4   :  { %v241_v20 = vmul.f32 %v238_v14, %v96_v17 }
  0xa5   :  { %v177_v19 = vpop.f32.mrf.mxu2 }
  0xa6   :  { %v178_v21 = vadd.f32 %v177_v19, %v149_v15  ;;  %v249_v28 = vmul.f32 %v245_v22, %v241_v20 }
  0xa7   :  { %v197_v23 = vpop.f32.mrf.mxu3 }
  0xa8   :  { %v198_v25 = vadd.f32 %v197_v23, %v178_v21  ;;  %v253_v31 = vsel %vm252_vm2, %v249_v28, 0.0 }
  0xaa   :  { %v240_v27 = vmul.f32 %v198_v25, %v76_v24 }
  0xac   :  { %v248_v29 = vmul.f32 %v244_v26, %v240_v27 }
  0xae   :  { %v251_v30 = vsel %vm250_vm1, %v248_v29, 0.0 }
  0xaf   :  { %v254_v32 = vadd.f32 %v253_v31, %v251_v30 }
  0xb1   :  { %255 = vadd.xlane.f32.xlu0 %v254_v32 }
 0x124   :  { %v256_v34 = vpop.xlane.xlu0 %255 }
 0x125   :  { %v261_v35 = vadd.f32 %v272_v33, %v256_v34 }
 0x127   :  { %263 = vst.msk [vmem:[%s543_s8] sm:$0x3] %vm262_vm3, %v261_v35 }

</bundles_post_ra>
